<compile_context>
chip_gen: v5e
topology: v5e:2x2
jax: 0.10.0
libtpu: 0.0.40
codegen_flags: <defaults>
</compile_context>

<pallas_src>
import jax
import jax.numpy as jnp
from jax.experimental import pallas as pl
from jax.experimental.pallas import tpu as pltpu


def _round_up(x: int, m: int) -> int:
    return ((x + m - 1) // m) * m


def _tpu_vmem_capacity() -> int:
    """Per-core VMEM bytes; conservative (v7x-sized) fallback if unavailable."""
    try:
        return int(pltpu.get_tpu_info().vmem_capacity_bytes)
    except Exception:
        return 64 << 20


# ----------------------------- kernel bodies -----------------------------

def _mean_pool_kernel_vpu(emb_ref, mask_ref, denom_ref, out_ref):
    """f32 path: mask-weighted sum on the VPU.

    emb_ref:   (TB, TS, TH)  embeddings tile (any float dtype, cast in-kernel)
    mask_ref:  (TB, TS, 1)   f32 mask tile
    denom_ref: (TB, 1)       f32 pre-clamped mask row-sums
    out_ref:   (TB, TH)      f32 output tile, resident accumulator over k
    """
    k = pl.program_id(2)

    @pl.when(k == 0)
    def _init():
        out_ref[...] = jnp.zeros_like(out_ref)

    emb = emb_ref[...].astype(jnp.float32)
    out_ref[...] += jnp.sum(emb * mask_ref[...], axis=1)

    @pl.when(k == pl.num_programs(2) - 1)
    def _finalize():
        # True division, once per output block -> exact PyTorch parity.
        out_ref[...] = out_ref[...] / denom_ref[...]


def _mean_pool_kernel_mxu(emb_ref, mask_ref, denom_ref, out_ref):
    """bf16/fp16 path: masked sum over S on the MXU (VPU stays idle).

    emb_ref:   (TB, TS, TH)  narrow-dtype embeddings tile
    mask_ref:  (TB, TS)      mask tile in the same dtype (0/1 -> exact)
    denom_ref: (TB, 1)       f32 pre-clamped mask row-sums
    out_ref:   (TB, TH)      f32 output tile, resident accumulator over k
    """
    k = pl.program_id(2)

    @pl.when(k == 0)
    def _init():
        out_ref[...] = jnp.zeros_like(out_ref)

    tb = out_ref.shape[0]          # static; TB <= 8 by construction
    for b in range(tb):            # unrolled per-row (1,TS) @ (TS,TH) MXU dots
        row = jnp.dot(mask_ref[pl.ds(b, 1), :], emb_ref[b],
                      preferred_element_type=jnp.float32)   # (1, TH) f32
        out_ref[pl.ds(b, 1), :] += row

    @pl.when(k == pl.num_programs(2) - 1)
    def _finalize():
        out_ref[...] = out_ref[...] / denom_ref[...]


# ----------------------------- tiling helpers -----------------------------

def _choose_tiles(B, S, H, itemsize, use_mxu, emb_tile_budget, maybe_two_tc):
    # Batch tile: mask/denom/output sublane dim must be a multiple of 8 or the
    # full batch. Small batches use the full dim; larger ones pad to 8.
    if B <= 8:
        TB, B_pad = B, B
    else:
        TB, B_pad = 8, _round_up(B, 8)

    # Hidden tile: split H only when a 2-TC chip (v7x) would otherwise see
    # fewer than 2 parallel blocks; on single-TC v5e/v6e it is pure overhead.
    TH = H
    if maybe_two_tc and (B_pad // TB) < 2 and H % 256 == 0:
        TH = H // 2

    # Sequence tile: whole (padded) sequence if it fits the per-step budget,
    # otherwise a 128-aligned slice (MXU path: the 2-D mask puts S on lanes;
    # 128 also satisfies every sublane packing). S is zero-padded to the tile.
    sub = {4: 8, 2: 16, 1: 32}.get(itemsize, 8)
    S_pad = _round_up(S, sub)
    if TB * S_pad * TH * itemsize <= emb_tile_budget:
        TS = S_pad
    else:
        align = 128 if use_mxu else sub
        TS = max(align, align * (emb_tile_budget // (TB * align * TH * itemsize)))
        TS = min(TS, _round_up(S, align))
        S_pad = _round_up(S, TS)
    return TB, B_pad, TS, S_pad, TH


# ------------------------------- wrapper ----------------------------------

def mean_pooling(model_output, attention_mask, *, emb_tile_bytes=None):
    """Pallas equivalent of MeanPooling.forward(model_output, attention_mask).

    `model_output` may be the (B, S, H) embeddings array or a tuple/list whose
    first element is that array (like the HF model output). Returns (B, H) f32.
    """
    token_embeddings = (model_output[0]
                        if isinstance(model_output, (tuple, list))
                        else model_output)
    B, S, H = token_embeddings.shape
    assert attention_mask.shape == (B, S)

    dtype = token_embeddings.dtype
    itemsize = jnp.dtype(dtype).itemsize
    use_mxu = jnp.issubdtype(dtype, jnp.floating) and itemsize <= 2

    # Generation-aware budgets (v5e/v6e: 128 MiB VMEM; v7x: 64 MiB, 2 TCs).
    vmem_cap = _tpu_vmem_capacity()
    big_vmem = vmem_cap >= (100 << 20)
    maybe_two_tc = not big_vmem
    if emb_tile_bytes is None:
        emb_tile_bytes = (16 << 20) if big_vmem else (8 << 20)

    TB, B_pad, TS, S_pad, TH = _choose_tiles(
        B, S, H, itemsize, use_mxu, emb_tile_bytes, maybe_two_tc)
    nb, nh, nk = B_pad // TB, H // TH, S_pad // TS

    # Denominator (torch.clamp(mask.sum(1), 1e-9)) computed once in the
    # wrapper -> no per-step mask reduction inside the kernel.
    mask_f32 = attention_mask.astype(jnp.float32)
    denom = jnp.maximum(jnp.sum(mask_f32, axis=1, keepdims=True), 1e-9)

    # Zero-padding is exact: padded mask entries are 0, padded rows are
    # sliced off; padded rows get denom 1.0 to keep the division benign.
    emb = token_embeddings
    if (B_pad, S_pad) != (B, S):
        emb = jnp.pad(emb, ((0, B_pad - B), (0, S_pad - S), (0, 0)))
        mask_f32 = jnp.pad(mask_f32, ((0, B_pad - B), (0, S_pad - S)))
    if B_pad != B:
        denom = jnp.pad(denom, ((0, B_pad - B), (0, 0)), constant_values=1.0)

    def _call(mxu_path: bool):
        if mxu_path:
            kernel = _mean_pool_kernel_mxu
            mask_in = mask_f32.astype(dtype)                    # (B_pad, S_pad)
            mask_spec = pl.BlockSpec((TB, TS), lambda b, h, k: (b, k))
            mask_tile = TB * TS * itemsize
            interm = 0
        else:
            kernel = _mean_pool_kernel_vpu
            mask_in = mask_f32.reshape(B_pad, S_pad, 1)         # (B_pad, S_pad, 1)
            mask_spec = pl.BlockSpec((TB, TS, 1), lambda b, h, k: (b, k, 0))
            mask_tile = TB * TS * 4
            interm = 2 * TB * TS * TH * 4    # f32 cast + product intermediates

        emb_tile = TB * TS * TH * itemsize
        out_tile = TB * TH * 4
        need = 2 * (emb_tile + mask_tile + TB * 4) + 2 * out_tile + interm
        cap = vmem_cap * 3 // 4                          # ~25% headroom
        vmem_limit = int(min(max(need * 3 // 2, min(32 << 20, cap)), cap))

        return pl.pallas_call(
            kernel,
            out_shape=jax.ShapeDtypeStruct((B_pad, H), jnp.float32),
            grid=(nb, nh, nk),
            in_specs=[
                pl.BlockSpec((TB, TS, TH), lambda b, h, k: (b, k, h)),
                mask_spec,
                pl.BlockSpec((TB, 1), lambda b, h, k: (b, 0)),
            ],
            out_specs=pl.BlockSpec((TB, TH), lambda b, h, k: (b, h)),
            compiler_params=pltpu.CompilerParams(
                dimension_semantics=("parallel", "parallel", "arbitrary"),
                vmem_limit_bytes=vmem_limit,
            ),
        )(emb, mask_in, denom)

    if use_mxu:
        try:
            out = _call(True)
        except Exception:
            # Safety net: if this Mosaic version rejects the small-M dots,
            # fall back to the dtype-generic VPU kernel (same tiling).
            out = _call(False)
    else:
        out = _call(False)

    return out[:B] if B_pad != B else out


# ------------------------------ reference ---------------------------------

def _reference(token_embeddings, attention_mask):
    mask = attention_mask[..., None].astype(jnp.float32)
    emb = token_embeddings.astype(jnp.float32)
    sum_emb = jnp.sum(emb * mask, axis=1)
    sum_mask = jnp.maximum(jnp.sum(mask, axis=1), 1e-9)
    return sum_emb / sum_mask


if __name__ == "__main__":
    key = jax.random.PRNGKey(0)
    k1, k2, k3, k4, k5, k6 = jax.random.split(key, 6)

    # Case 1: module-sized small f32 case (B=2, S=8, H=32) -> VPU path, nk=1.
    B, S, H = 2, 8, 32
    emb = jax.random.normal(k1, (B, S, H), dtype=jnp.float32)
    mask = (jax.random.uniform(k2, (B, S)) > 0.3).astype(jnp.float32)
    mask = mask.at[:, 0].set(1.0)
    out = mean_pooling((emb,), mask)          # tuple input, like model_output
    jax.block_until_ready(out)
    assert out.shape == (B, H) and out.dtype == jnp.float32
    assert jnp.allclose(out, _reference(emb, mask), atol=1e-5, rtol=1e-5)

    # Case 2: bf16 embeddings -> MXU masked-sum path (S padded 8 -> 16).
    emb_bf16 = emb.astype(jnp.bfloat16)
    out2 = mean_pooling(emb_bf16, mask)
    jax.block_until_ready(out2)
    assert jnp.allclose(out2, _reference(emb_bf16, mask), atol=1e-4, rtol=1e-4)

    # Case 3: f32 with a tiny tile budget -> sequence-tiled reduction (nk=4),
    # plus a fully masked row to exercise the 1e-9 clamp.
    B3, S3, H3 = 2, 32, 32
    emb3 = jax.random.normal(k3, (B3, S3, H3), dtype=jnp.float32)
    mask3 = (jax.random.uniform(k4, (B3, S3)) > 0.5).astype(jnp.float32)
    mask3 = mask3.at[0, 0].set(1.0)
    mask3 = mask3.at[1, :].set(0.0)
    out3 = mean_pooling(emb3, mask3, emb_tile_bytes=2048)
    jax.block_until_ready(out3)
    assert jnp.allclose(out3, _reference(emb3, mask3), atol=1e-5, rtol=1e-5)

    # Case 4: bf16 with non-multiple-of-8 batch and odd sequence length ->
    # exercises zero padding (B 12->16, S 200->256) and the k-axis accumulator.
    B4, S4, H4 = 12, 200, 128
    emb4 = jax.random.normal(k5, (B4, S4, H4), dtype=jnp.bfloat16)
    mask4 = (jax.random.uniform(k6, (B4, S4)) > 0.4).astype(jnp.float32)
    mask4 = mask4.at[:, 0].set(1.0)
    out4 = mean_pooling(emb4, mask4, emb_tile_bytes=4096)
    jax.block_until_ready(out4)
    assert out4.shape == (B4, H4)
    assert jnp.allclose(out4, _reference(emb4, mask4), atol=1e-4, rtol=1e-4)

    print("KERNEL_OK")
</pallas_src>

<mosaic_0001>
module attributes {stable_mosaic.version = 11 : i64} {
  func.func @_mean_pool_kernel_vpu(%arg0: i32, %arg1: i32, %arg2: i32, %arg3: memref<2x8x32xf32, #tpu.memory_space<vmem>>, %arg4: memref<2x8x1xf32, #tpu.memory_space<vmem>>, %arg5: memref<2x1xf32, #tpu.memory_space<vmem>>, %arg6: memref<2x32xf32, #tpu.memory_space<vmem>>) attributes {dimension_semantics = [#tpu.dimension_semantics<parallel>, #tpu.dimension_semantics<parallel>, #tpu.dimension_semantics<arbitrary>], iteration_bounds = array<i64: 1, 1, 1>, scalar_prefetch = 0 : i64, scratch_operands = 0 : i64, tpu.core_type = #tpu.core_type<tc>, window_params = [{transform_indices = @transform_0, window_bounds = array<i64: 2, 8, 32>}, {transform_indices = @transform_1, window_bounds = array<i64: 2, 8, 1>}, {transform_indices = @transform_2, window_bounds = array<i64: 2, 1>}, {transform_indices = @transform_3, window_bounds = array<i64: 2, 32>}]} {
    %c0_i32 = arith.constant 0 : i32
    %0 = arith.cmpi eq, %arg2, %c0_i32 : i32
    %1 = arith.extui %0 : i1 to i32
    %c0_i32_0 = arith.constant 0 : i32
    %2 = arith.cmpi ne, %1, %c0_i32_0 : i32
    scf.if %2 {
      %cst_12 = arith.constant 0.000000e+00 : f32
      %14 = vector.broadcast %cst_12 : f32 to vector<2x32xf32>
      %c0_13 = arith.constant 0 : index
      %c0_14 = arith.constant 0 : index
      %15 = vector.load %arg6[%c0_13, %c0_14] : memref<2x32xf32, #tpu.memory_space<vmem>>, vector<2x32xf32>
      tpu.vector_store %arg6[%c0_13, %c0_14], %14 {strides = array<i32>} : memref<2x32xf32, #tpu.memory_space<vmem>>, vector<2x32xf32>,
    } else {
    }
    %c0 = arith.constant 0 : index
    %c0_1 = arith.constant 0 : index
    %c0_2 = arith.constant 0 : index
    %3 = vector.load %arg3[%c0, %c0_1, %c0_2] : memref<2x8x32xf32, #tpu.memory_space<vmem>>, vector<2x8x32xf32>
    %c0_3 = arith.constant 0 : index
    %c0_4 = arith.constant 0 : index
    %4 = vector.load %arg6[%c0_3, %c0_4] : memref<2x32xf32, #tpu.memory_space<vmem>>, vector<2x32xf32>
    %c0_5 = arith.constant 0 : index
    %c0_6 = arith.constant 0 : index
    %c0_7 = arith.constant 0 : index
    %5 = vector.load %arg4[%c0_5, %c0_6, %c0_7] : memref<2x8x1xf32, #tpu.memory_space<vmem>>, vector<2x8x1xf32>
    %6 = vector.broadcast %5 : vector<2x8x1xf32> to vector<2x8x32xf32>
    %7 = arith.mulf %3, %6 : vector<2x8x32xf32>
    %cst = arith.constant dense<0.000000e+00> : vector<2x32xf32>
    %8 = vector.multi_reduction <add>, %7, %cst [1] : vector<2x8x32xf32> to vector<2x32xf32>
    %9 = arith.addf %4, %8 : vector<2x32xf32>
    %c0_8 = arith.constant 0 : index
    %c0_9 = arith.constant 0 : index
    %10 = vector.load %arg6[%c0_8, %c0_9] : memref<2x32xf32, #tpu.memory_space<vmem>>, vector<2x32xf32>
    tpu.vector_store %arg6[%c0_8, %c0_9], %9 {strides = array<i32>} : memref<2x32xf32, #tpu.memory_space<vmem>>, vector<2x32xf32>,
    %c0_i32_10 = arith.constant 0 : i32
    %11 = arith.cmpi eq, %arg2, %c0_i32_10 : i32
    %12 = arith.extui %11 : i1 to i32
    %c0_i32_11 = arith.constant 0 : i32
    %13 = arith.cmpi ne, %12, %c0_i32_11 : i32
    scf.if %13 {
      %c0_12 = arith.constant 0 : index
      %c0_13 = arith.constant 0 : index
      %14 = vector.load %arg6[%c0_12, %c0_13] : memref<2x32xf32, #tpu.memory_space<vmem>>, vector<2x32xf32>
      %c0_14 = arith.constant 0 : index
      %c0_15 = arith.constant 0 : index
      %15 = vector.load %arg5[%c0_14, %c0_15] : memref<2x1xf32, #tpu.memory_space<vmem>>, vector<2x1xf32>
      %16 = vector.broadcast %15 : vector<2x1xf32> to vector<2x32xf32>
      %17 = arith.divf %14, %16 : vector<2x32xf32>
      %c0_16 = arith.constant 0 : index
      %c0_17 = arith.constant 0 : index
      %18 = vector.load %arg6[%c0_16, %c0_17] : memref<2x32xf32, #tpu.memory_space<vmem>>, vector<2x32xf32>
      tpu.vector_store %arg6[%c0_16, %c0_17], %17 {strides = array<i32>} : memref<2x32xf32, #tpu.memory_space<vmem>>, vector<2x32xf32>,
    } else {
    }
    return
  }
  func.func @transform_0(%arg0: i32, %arg1: i32, %arg2: i32) -> (i32, i32, i32) {
    %c0_i32 = arith.constant 0 : i32
    return %arg0, %arg2, %arg1 : i32, i32, i32
  }
  func.func @transform_1(%arg0: i32, %arg1: i32, %arg2: i32) -> (i32, i32, i32) {
    %c0_i32 = arith.constant 0 : i32
    %c0_i32_0 = arith.constant 0 : i32
    return %arg0, %arg2, %c0_i32 : i32, i32, i32
  }
  func.func @transform_2(%arg0: i32, %arg1: i32, %arg2: i32) -> (i32, i32) {
    %c0_i32 = arith.constant 0 : i32
    %c0_i32_0 = arith.constant 0 : i32
    return %arg0, %c0_i32 : i32, i32
  }
  func.func @transform_3(%arg0: i32, %arg1: i32, %arg2: i32) -> (i32, i32) {
    %c0_i32 = arith.constant 0 : i32
    return %arg0, %arg1 : i32, i32
  }
}

</mosaic_0001>

<bundles_post_ra>
// kernel: tpu_custom_call.1
= control target key start
LH: loop header
LB: loop body
LE: loop exit
PB: predicated region body
PF: predicated region fallthrough
CT: control target
= control target key end

     0   :  { %v136_v2 = vmov 0   ;;  %s180_s0 = inlined_call_operand.vmem [shape: f32[2,8,32], index: 0, kind: input, shape index: {}]   ;;  %s181_s1 = inlined_call_operand.vmem [shape: f32[2,8,1], index: 1, kind: input, shape index: {}]   ;;  %s182_s2 = inlined_call_operand.vmem [shape: f32[2,1], index: 2, kind: input, shape index: {}]   ;;  %s183_s3 = inlined_call_operand.hbm [shape: f32[2,32], index: 3, kind: output, shape index: {}]  }
   0x1   :  { %v24_v0 = vld [vmem:[%s181_s1] sm:$0xff]  ;;  %106 = vset.pattern.permute.xlu0 %v136_v2  ;;  %107 = vset.pattern.permute.xlu1 %v136_v2 }
   0x2   :  { %v65_v1 = vld [vmem:[%s182_s2] sm:$0x3] }
   0x3   :  { %8 = vsyncpa [#allocation3], 0  ;;  %28 = vperm.xlu0 %106, %v24_v0   ;;  %68 = vperm.xlu1 %107, %v65_v1   ;;  %v25_v3 = vld [vmem:[%s181_s1 + $0x8] sm:$0xff]  ;;  %vm19_vm0 = vcmask 254976   ;;  %v137_v4 = vmov 0.0   ;;  %v21_v5 = vld [vmem:[%s180_s0] sm:$0xff] }
   0x4   :  { %20 = vst.msk [vmem:[#allocation2] sm:$0x3] %vm19_vm0, %v137_v4  ;;  %vm38_vm1 = vcmask 261120   ;;  %v22_v12 = vld [vmem:[%s180_s0 + $0x8] sm:$0xff]  ;;  %vm55_vm2 = vcmask 1041409   ;;  %s138_s0 = smov [#allocation2]  }
   0x5   :  { %s92_s1 = sshll.u32 %s138_s0, 4  ;;  %s94_s23 = sshll.u32 %s183_s3, 4  ;;  %s93_s1 = int_to_ptr.vmem [resolvable:$true] %s92_s1  ;;  %s95_s23 = int_to_ptr.hbm [resolvable:$true] %s94_s23 }
   0xb   :  { %33 = vperm.xlu0 %106, %v25_v3   ;;  %v23_v29 = vld [vmem:[#allocation2] sm:$0x3] }
  0x75   :  { %v29_v6 = vpop.permute.xlu0 %28  ;;  %v69_v9 = vpop.permute.xlu1 %68 }
  0x76   :  { %v36_v7 = vmul.f32 %v29_v6, %v21_v5  ;;  %108 = vrcp.f32 %v69_v9  ;;  %vm76_vm3 = vweird.f32 %v69_v9  ;;  %v82_v33 = vand.u32 2147483648, %v69_v9 }
  0x77   :  { %v80_v35 = vand.u32 2147483647, %v69_v9 }
  0x78   :  { %v39_v8 = vsel %vm38_vm1, %v36_v7, 0.0  ;;  %v83_v36 = vor.u32 1.1754944e-38, %v82_v33 }
  0x79   :  { %v40_v10 = vrot.slane %v39_v8, 4  ;;  %vm81_vm6 = vcmp.eq.f32.partialorder %v80_v35, 8.507059e+37 }
  0x7b   :  { %v41_v11 = vadd.f32 %v40_v10, %v39_v8 }
  0x7c   :  { %v109_v17 = vpop.eup %108 }
  0x7d   :  { %v34_v13 = vpop.permute.xlu0 %33  ;;  %v42_v15 = vrot.slane %v41_v11, 2  ;;  %v72_v21 = vmul.f32 %v109_v17, %v69_v9  ;;  %vm77_vm4 = vweird.f32 %v109_v17 }
  0x7e   :  { %v37_v14 = vmul.f32 %v34_v13, %v22_v12  ;;  %vm78_vm5 = vmor %vm76_vm3, %vm77_vm4 }
  0x7f   :  { %v43_v19 = vadd.f32 %v42_v15, %v41_v11  ;;  %v73_v25 = vsub.f32 1.0, %v72_v21 }
  0x80   :  { %v46_v16 = vsel %vm38_vm1, %v37_v14, 0.0 }
  0x81   :  { %v47_v18 = vrot.slane %v46_v16, 4  ;;  %v44_v23 = vrot.slane %v43_v19, 1  ;;  %v74_v30 = vmul.f32 %v109_v17, %v73_v25 }
  0x83   :  { %v48_v20 = vadd.f32 %v47_v18, %v46_v16  ;;  %v45_v27 = vadd.f32 %v44_v23, %v43_v19  ;;  %v75_v34 = vadd.f32 %v109_v17, %v74_v30 }
  0x85   :  { %v49_v22 = vrot.slane %v48_v20, 2  ;;  %v79_v37 = vsel %vm78_vm5, %v109_v17, %v75_v34 }
  0x86   :  { %v84_v38 = vsel %vm81_vm6, %v83_v36, %v79_v37 }
  0x87   :  { %v50_v24 = vadd.f32 %v49_v22, %v48_v20 }
  0x89   :  { %v51_v26 = vrot.slane %v50_v24, 1 }
  0x8b   :  { %v52_v28 = vadd.f32 %v51_v26, %v50_v24 }
  0x8d   :  { %v56_v31 = vsel %vm55_vm2, %v52_v28, %v45_v27 }
  0x8e   :  { %v58_v32 = vadd.f32 %v56_v31, %v23_v29 }
  0x90   :  { %60 = vst.msk [vmem:[#allocation2] sm:$0x3] %vm19_vm0, %v58_v32 }
  0x97   :  { %v64_v39 = vld [vmem:[#allocation2] sm:$0x3] }
  0x98   :  { %v85_v40 = vmul.f32 %v84_v38, %v64_v39 }
  0x9a   :  { %86 = vst.msk [vmem:[#allocation2] sm:$0x3] %vm19_vm0, %v85_v40 }
  0x9b   :  { %97 = dma.vmem_to_hbm [thread:$0]  %s93_s1, 32, %s95_s23, [#allocation3]  }
  0x9c   :  { %134 = dma.done.wait [#allocation3], 32  }
  0x9d   :  { %135 = vsyncadd [#allocation3], 4294967264 }
  0x9e   :  { %102 = vsyncpa [#allocation3], 1 }

</bundles_post_ra>
